<compile_context>
chip_gen: v7x
topology: tpu7x:2x2x1
jax: 0.10.0
libtpu: 0.0.40
codegen_flags: <defaults>
</compile_context>

<pallas_src>
import jax
import jax.numpy as jnp
from jax.experimental import pallas as pl
from jax.experimental.pallas import tpu as pltpu


def _swish_kernel(x_ref, o_ref):
    x = x_ref[...]
    xf = x.astype(jnp.float32)  # f32 math keeps bf16 inputs accurate (EUP exp)
    o_ref[...] = (xf * jax.nn.sigmoid(xf)).astype(o_ref.dtype)


def _swish_2d(x2d, block_rows):
    rows, lanes = x2d.shape
    grid = (pl.cdiv(rows, block_rows),)  # partial last block handled by Pallas
    return pl.pallas_call(
        _swish_kernel,
        out_shape=jax.ShapeDtypeStruct((rows, lanes), x2d.dtype),
        grid=grid,
        in_specs=[pl.BlockSpec((block_rows, lanes), lambda i: (i, 0))],
        out_specs=pl.BlockSpec((block_rows, lanes), lambda i: (i, 0)),
        compiler_params=pltpu.CompilerParams(
            dimension_semantics=("parallel",),   # megacore split on v7x
            vmem_limit_bytes=32 * 1024 * 1024,   # explicit cap: safe on v5e too
        ),
    )(x2d)


def _pick_block_rows(rows, lanes, itemsize, target_block_bytes):
    # ~target_block_bytes per block, rounded to a multiple of 8 (sublane).
    # If the whole array is smaller than one block, the full dim is always
    # legal (block_shape == array dims).
    br = max(8, (target_block_bytes // (lanes * itemsize)) // 8 * 8)
    return rows if rows <= br else br


def _pick_lanes(n):
    # Widest lane count (multiple of 128) dividing n; prefer one that also
    # yields rows % 8 == 0 so vregs are fully populated.
    candidates = (1024, 512, 256, 128)
    for lanes in candidates:
        if n % lanes == 0 and (n // lanes) % 8 == 0:
            return lanes
    for lanes in candidates:
        if n % lanes == 0:
            return lanes
    return None


def swish(x, *, target_block_bytes=4 * 1024 * 1024):
    """Elementwise x * sigmoid(x) via a Pallas TPU kernel (any shape/dtype)."""
    orig_shape = x.shape
    n = x.size
    if n == 0:
        return x
    itemsize = jnp.dtype(x.dtype).itemsize

    lanes = _pick_lanes(n)
    if lanes is not None:
        # Fast path: no padding, no trailing slice, single streaming HBM pass.
        rows = n // lanes
        block_rows = _pick_block_rows(rows, lanes, itemsize, target_block_bytes)
        out2d = _swish_2d(x.reshape(rows, lanes), block_rows)
        return out2d.reshape(orig_shape)

    # Ragged fallback (n not a multiple of 128): pad only to a multiple of
    # 8*128 elements (not block_rows*lanes), then slice the small tail off.
    lanes = 128
    chunk = 8 * lanes
    n_pad = pl.cdiv(n, chunk) * chunk
    flat = jnp.pad(x.reshape(-1), (0, n_pad - n))
    rows = n_pad // lanes
    block_rows = _pick_block_rows(rows, lanes, itemsize, target_block_bytes)
    out2d = _swish_2d(flat.reshape(rows, lanes), block_rows)
    return out2d.reshape(-1)[:n].reshape(orig_shape)


if __name__ == "__main__":
    key = jax.random.PRNGKey(0)

    # NCHW input, consistent with the PyTorch module.
    x = jax.random.normal(key, (2, 4, 16, 16), dtype=jnp.float32)
    y = jax.block_until_ready(swish(x))
    y_ref = x * jax.nn.sigmoid(x)
    assert y.shape == x.shape and y.dtype == x.dtype
    assert jnp.allclose(y, y_ref, atol=1e-6, rtol=1e-6)

    # Ragged-size input exercising the minimal-padding fallback path.
    x2 = jax.random.normal(jax.random.PRNGKey(1), (3, 5, 7), dtype=jnp.float32)
    y2 = jax.block_until_ready(swish(x2))
    y2_ref = x2 * jax.nn.sigmoid(x2)
    assert y2.shape == x2.shape and y2.dtype == x2.dtype
    assert jnp.allclose(y2, y2_ref, atol=1e-6, rtol=1e-6)

    # bf16 path (f32 internal math, bf16 store).
    x3 = jax.random.normal(jax.random.PRNGKey(2), (2, 4, 16, 16), dtype=jnp.bfloat16)
    y3 = jax.block_until_ready(swish(x3))
    y3_ref = (x3.astype(jnp.float32) * jax.nn.sigmoid(x3.astype(jnp.float32))).astype(jnp.bfloat16)
    assert y3.shape == x3.shape and y3.dtype == x3.dtype
    assert jnp.allclose(y3.astype(jnp.float32), y3_ref.astype(jnp.float32), atol=1e-2, rtol=1e-2)

    print("KERNEL_OK")
</pallas_src>

<mosaic_0001>
module attributes {stable_mosaic.version = 11 : i64} {
  func.func @_swish_kernel(%arg0: i32, %arg1: memref<8x256xf32, #tpu.memory_space<vmem>>, %arg2: memref<8x256xf32, #tpu.memory_space<vmem>>) attributes {dimension_semantics = [#tpu.dimension_semantics<parallel>], iteration_bounds = array<i64: 1>, scalar_prefetch = 0 : i64, scratch_operands = 0 : i64, tpu.core_type = #tpu.core_type<tc>, window_params = [{transform_indices = @transform_0, window_bounds = array<i64: 8, 256>}, {transform_indices = @transform_1, window_bounds = array<i64: 8, 256>}]} {
    %c0 = arith.constant 0 : index
    %c0_0 = arith.constant 0 : index
    %0 = vector.load %arg1[%c0, %c0_0] : memref<8x256xf32, #tpu.memory_space<vmem>>, vector<8x256xf32>
    %1 = arith.negf %0 : vector<8x256xf32>
    %2 = math.exp %1 : vector<8x256xf32>
    %cst = arith.constant 1.000000e+00 : f32
    %3 = vector.broadcast %cst : f32 to vector<8x256xf32>
    %4 = arith.addf %3, %2 : vector<8x256xf32>
    %5 = arith.divf %3, %4 : vector<8x256xf32>
    %6 = arith.mulf %0, %5 : vector<8x256xf32>
    %c0_1 = arith.constant 0 : index
    %c0_2 = arith.constant 0 : index
    %7 = vector.load %arg2[%c0_1, %c0_2] : memref<8x256xf32, #tpu.memory_space<vmem>>, vector<8x256xf32>
    tpu.vector_store %arg2[%c0_1, %c0_2], %6 {strides = array<i32>} : memref<8x256xf32, #tpu.memory_space<vmem>>, vector<8x256xf32>,
    return
  }
  func.func @transform_0(%arg0: i32) -> (i32, i32) {
    %c0_i32 = arith.constant 0 : i32
    %c0_i32_0 = arith.constant 0 : i32
    return %arg0, %c0_i32 : i32, i32
  }
  func.func @transform_1(%arg0: i32) -> (i32, i32) {
    %c0_i32 = arith.constant 0 : i32
    %c0_i32_0 = arith.constant 0 : i32
    return %arg0, %c0_i32 : i32, i32
  }
}

</mosaic_0001>

<bundles_post_ra>
// kernel: tpu_custom_call.1
= control target key start
LH: loop header
LB: loop body
LE: loop exit
PB: predicated region body
PF: predicated region fallthrough
CT: control target
= control target key end

     0   :  { %6 = vsyncpa [#allocation3], 0  ;;  %s150_s0 = inlined_call_operand.hbm [shape: f32[8,256], index: 0, kind: input, shape index: {}]   ;;  %s151_s1 = inlined_call_operand.hbm [shape: f32[8,256], index: 1, kind: output, shape index: {}]  }
   0x1   :  { %7 = vsyncpa [#allocation4], 0  ;;  %s114_s6 = smov [#allocation2]   ;;  %s66_s10 = scalar_lea.hbm %s150_s0, 256 }
   0x2   :  { %s14_s7 = sshll.u32 %s114_s6, 4  ;;  %p67_p0 = scmp.ne.s32.totalorder %s150_s0, %s66_s10  ;;  %s15_s7 = int_to_ptr.vmem [resolvable:$true] %s14_s7 }
   0x3   :  { %p70_p1 = scmp.lt.u32.totalorder %s66_s10, %s150_s0 }
   0x5   :  { %p72_p2 = pnand %p70_p1, %p67_p0 }
   0x7   :  { %75 = shalt.err (!%p72_p2)
}
   0x8   :  { %s76_s15 = scalar_lea.vmem %s15_s7, 256  ;;  %p81_p4 = scmp.lt.s32.totalorder %s15_s7, %s15_s7 }
   0x9   :  { %p77_p3 = scmp.ne.s32.totalorder %s15_s7, %s76_s15  ;;  %p82_p5 = scmp.lt.s32.totalorder %s76_s15, %s76_s15 }
   0xb   :  { %p83_p6 = por %p82_p5, %p81_p4 }
   0xd   :  { %p84_p7 = pnand %p83_p6, %p77_p3 }
   0xf   :  { %87 = shalt.err (!%p84_p7)
}
  0x10   :  { %17 = dma.hbm_to_vmem [thread:$0]  %s150_s0, 256, %s15_s7, [#allocation3]  }
  0x11   :  { %110 = dma.done.wait [#allocation3], 256  }
  0x12   :  { %111 = vsyncadd [#allocation3], 4294967040  ;;  %v21_v0 = vld [vmem:[#allocation2] sm:$0xff]  ;;  %v22_v1 = vld [vmem:[#allocation2 + $0x8] sm:$0xff]  ;;  %s115_s18 = smov [#allocation5]  }
  0x13   :  { %v54_v2 = vmul.f32 -1.442695, %v21_v0  ;;  %v55_v3 = vmul.f32 -1.442695, %v22_v1  ;;  %s45_s19 = sshll.u32 %s115_s18, 4  ;;  %s46_s19 = int_to_ptr.vmem [resolvable:$true] %s45_s19 }
  0x14   :  { %s88_s0 = scalar_lea.vmem %s46_s19, 256  ;;  %p93_p9 = scmp.lt.s32.totalorder %s46_s19, %s46_s19 }
  0x15   :  { %58 = vpow2.f32 %v54_v2  ;;  %p89_p8 = scmp.ne.s32.totalorder %s46_s19, %s88_s0  ;;  %p94_p10 = scmp.lt.s32.totalorder %s88_s0, %s88_s0 }
  0x16   :  { %60 = vpow2.f32 %v55_v3 }
  0x17   :  { %p95_p11 = por %p94_p10, %p93_p9 }
  0x19   :  { %p96_p12 = pnand %p95_p11, %p89_p8 }
  0x1f   :  { %v59_v4 = vpop.eup %58 }
  0x20   :  { %v61_v5 = vpop.eup %60  ;;  %v29_v6 = vadd.f32 1.0, %v59_v4 }
  0x21   :  { %v30_v7 = vadd.f32 1.0, %v61_v5 }
  0x22   :  { %62 = vrcp.f32 %v29_v6 }
  0x23   :  { %64 = vrcp.f32 %v30_v7 }
  0x2c   :  { %v63_v8 = vpop.eup %62 }
  0x2d   :  { %v65_v9 = vpop.eup %64  ;;  %v35_v10 = vmul.f32 %v63_v8, %v21_v0 }
  0x2e   :  { %v36_v11 = vmul.f32 %v65_v9, %v22_v1 }
  0x2f   :  { %37 = vst [vmem:[#allocation5] sm:$0xff] %v35_v10 }
  0x30   :  { %38 = vst [vmem:[#allocation5 + $0x8] sm:$0xff] %v36_v11 }
  0x31   :  { %99 = shalt.err (!%p96_p12)
}
  0x32   :  { %s100_s22 = scalar_lea.hbm %s151_s1, 256 }
  0x33   :  { %p101_p13 = scmp.ne.s32.totalorder %s151_s1, %s100_s22  ;;  %p104_p0 = scmp.lt.u32.totalorder %s100_s22, %s151_s1 }
  0x35   :  { %p106_p1 = pnand %p104_p0, %p101_p13 }
  0x37   :  { %109 = shalt.err (!%p106_p1)
}
  0x38   :  { %48 = dma.vmem_to_hbm [thread:$0]  %s46_s19, 256, %s151_s1, [#allocation4]  }
  0x39   :  { %112 = dma.done.wait [#allocation4], 256  }
  0x3a   :  { %113 = vsyncadd [#allocation4], 4294967040 }
  0x3b   :  { %52 = vsyncpa [#allocation3], 1 }
  0x3c   :  { %53 = vsyncpa [#allocation4], 1 }

</bundles_post_ra>
